<compile_context>
chip_gen: v6e
topology: v6e:2x2x1
jax: 0.10.0
libtpu: 0.0.40
codegen_flags: <defaults>
</compile_context>

<pallas_src>
import functools

import jax
import jax.numpy as jnp
from jax import lax
from jax.experimental import pallas as pl
from jax.experimental.pallas import tpu as pltpu

EPS = 1e-5            # BatchNorm1d default eps
NEG_SLOPE = 0.1       # LeakyReLU negative_slope
HALO_BLK = 128        # halo block width along L (lane multiple); requires K-1 <= 128
_VMEM_LIMIT = 32 * 1024 * 1024


def _round_up(x, m):
    return (x + m - 1) // m * m


# ---------------------------------------------------------------------------
# Shared conv-on-a-tile helper (NCL, lane-dense): (C_out, TL) f32.
# ---------------------------------------------------------------------------
def _conv_tile(x_ref, xh_ref, w_ref, *, K, TL):
    # x_ref : (1, C_in, TL)       current input tile (compute dtype, bf16)
    # xh_ref: (1, C_in, HALO_BLK) halo columns following the tile
    # w_ref : (C_out, K*C_in)     weight, column index = k*C_in + c_in
    window = jnp.concatenate([x_ref[0], xh_ref[0]], axis=-1)   # (C_in, TL+HALO)
    cols = [window[:, k:k + TL] for k in range(K)]             # K static lane shifts
    im2col = jnp.concatenate(cols, axis=0)                     # (K*C_in, TL), bf16
    return jnp.dot(w_ref[...], im2col,
                   preferred_element_type=jnp.float32)         # (C_out, TL) f32


# ---------------------------------------------------------------------------
# Pass 1: per-tile BatchNorm partial statistics only (no conv writeback).
# ---------------------------------------------------------------------------
def _stats_kernel(x_ref, xh_ref, w_ref, stats_ref, *, K, TL, L_out):
    j = pl.program_id(1)
    conv = _conv_tile(x_ref, xh_ref, w_ref, K=K, TL=TL)        # (C_out, TL)

    # mask output positions beyond L_out (last tile may be padded)
    col = lax.broadcasted_iota(jnp.int32, (1, TL), 1) + j * TL
    valid = (col < L_out).astype(jnp.float32)                  # (1, TL)
    cm = conv * valid
    s = jnp.sum(cm, axis=-1, keepdims=True)                    # (C_out, 1)
    sq = jnp.sum(cm * conv, axis=-1, keepdims=True)            # (C_out, 1)
    stats_ref[0, 0] = jnp.concatenate([s, sq], axis=-1)        # (C_out, 2)


# ---------------------------------------------------------------------------
# Pass 2: recompute conv, folded BN affine (one FMA) + LeakyReLU, NCL output.
# ---------------------------------------------------------------------------
def _bn_act_kernel(x_ref, xh_ref, w_ref, ss_ref, o_ref, *, K, TL):
    # ss_ref: (C_out, 2) f32 = [scale, shift] per channel
    conv = _conv_tile(x_ref, xh_ref, w_ref, K=K, TL=TL)        # (C_out, TL)
    y = conv * ss_ref[:, 0:1] + ss_ref[:, 1:2]
    o_ref[0] = jnp.maximum(y, NEG_SLOPE * y)                   # LeakyReLU(0.1)


# ---------------------------------------------------------------------------
# Wrapper (PyTorch NCL in / NCL out).  stride=1, dilation=1 (module defaults).
# ---------------------------------------------------------------------------
@functools.partial(jax.jit,
                   static_argnames=("padding", "tile_l", "compute_dtype"))
def downsampling_layer(x, w, b, gamma, beta, padding=7, tile_l=None,
                       compute_dtype=jnp.bfloat16):
    # NOTE: `b` (Conv1d bias) provably cancels under training-mode BatchNorm
    # (y depends only on conv - batch_mean), so it is not used by the kernels.
    N, C_in, L = x.shape
    C_out, _, K = w.shape
    assert K - 1 <= HALO_BLK, "kernel_size-1 must fit in one 128-wide halo block"
    L_out = L + 2 * padding - (K - 1)                 # stride=1, dilation=1
    assert L_out > 0

    # ---- L-tile selection: big lane-dense tiles, but >=4 grid steps (v7x) ----
    if tile_l is None:
        tl = min(_round_up(L_out, 128), 8192)
        while N * (-(-L_out // tl)) < 4 and tl >= 256:
            tl = _round_up(tl // 2, 128)
        tile_l = tl
    TL = tile_l
    assert TL % 128 == 0, "tile_l must be a multiple of 128"
    num_tiles = -(-L_out // TL)
    L_pad_out = num_tiles * TL
    L_in_pad = L_pad_out + HALO_BLK                   # main tiles + one halo block
    r = TL // HALO_BLK

    # ---- wrapper relayout: bf16 cast fused with zero pad along L (stays NCL) --
    right = L_in_pad - padding - L
    x_p = jnp.pad(x.astype(compute_dtype), ((0, 0), (0, 0), (padding, right)))

    # weight (C_out, C_in, K) -> (C_out, K*C_in), column index = k*C_in + c_in
    w2 = jnp.transpose(w, (0, 2, 1)).reshape(C_out, K * C_in).astype(compute_dtype)

    x_main_spec = pl.BlockSpec((1, C_in, TL), lambda n, j: (n, 0, j))
    x_halo_spec = pl.BlockSpec((1, C_in, HALO_BLK), lambda n, j: (n, 0, (j + 1) * r))
    w_spec = pl.BlockSpec((C_out, K * C_in), lambda n, j: (0, 0))
    cparams = pltpu.CompilerParams(
        dimension_semantics=("parallel", "parallel"),
        vmem_limit_bytes=_VMEM_LIMIT)

    # ---- pass 1: per-tile partial stats ---------------------------------------
    stats = pl.pallas_call(
        functools.partial(_stats_kernel, K=K, TL=TL, L_out=L_out),
        grid=(N, num_tiles),
        in_specs=[x_main_spec, x_halo_spec, w_spec],
        out_specs=pl.BlockSpec((1, 1, C_out, 2), lambda n, j: (n, j, 0, 0)),
        out_shape=jax.ShapeDtypeStruct((N, num_tiles, C_out, 2), jnp.float32),
        compiler_params=cparams,
    )(x_p, x_p, w2)

    # ---- tiny cross-tile reduction + BN folding (negligible XLA work) ---------
    tot = jnp.sum(stats, axis=(0, 1))                          # (C_out, 2)
    cnt = jnp.float32(N * L_out)
    mean = tot[:, 0] / cnt
    var = jnp.maximum(tot[:, 1] / cnt - mean * mean, 0.0)      # biased (training BN)
    scale = gamma.astype(jnp.float32) * lax.rsqrt(var + EPS)
    shift = beta.astype(jnp.float32) - mean * scale
    ss = jnp.stack([scale, shift], axis=1)                     # (C_out, 2)

    # ---- pass 2: recompute conv + affine + LeakyReLU, lane-dense NCL output ---
    out = pl.pallas_call(
        functools.partial(_bn_act_kernel, K=K, TL=TL),
        grid=(N, num_tiles),
        in_specs=[x_main_spec, x_halo_spec, w_spec,
                  pl.BlockSpec((C_out, 2), lambda n, j: (0, 0))],
        out_specs=pl.BlockSpec((1, C_out, TL), lambda n, j: (n, 0, j)),
        out_shape=jax.ShapeDtypeStruct((N, C_out, L_pad_out), jnp.float32),
        compiler_params=cparams,
    )(x_p, x_p, w2, ss)

    if L_pad_out != L_out:
        out = out[:, :, :L_out]
    return out


# ---------------------------------------------------------------------------
# Pure-JAX reference mirroring the PyTorch forward (training-mode BN).
# ---------------------------------------------------------------------------
def _reference(x, w, b, gamma, beta, padding=7):
    conv = lax.conv_general_dilated(
        x.astype(jnp.float32), w.astype(jnp.float32),
        window_strides=(1,), padding=[(padding, padding)],
        dimension_numbers=("NCH", "OIH", "NCH"),
    ) + b.reshape(1, -1, 1)
    mean = jnp.mean(conv, axis=(0, 2), keepdims=True)
    var = jnp.mean((conv - mean) ** 2, axis=(0, 2), keepdims=True)
    y = (conv - mean) * lax.rsqrt(var + EPS)
    y = y * gamma.reshape(1, -1, 1) + beta.reshape(1, -1, 1)
    return jnp.where(y > 0, y, NEG_SLOPE * y)


if __name__ == "__main__":
    # Conv1d(channel_in=4, channel_out=8, kernel_size=15, stride=1, padding=7)
    C_in, C_out, K, PAD = 4, 8, 15, 7

    key = jax.random.PRNGKey(0)
    kx, kw, kb, kg, kbt, kx2 = jax.random.split(key, 6)
    w = jax.random.normal(kw, (C_out, C_in, K), dtype=jnp.float32) * 0.1
    b = jax.random.normal(kb, (C_out,), dtype=jnp.float32) * 0.1
    gamma = 1.0 + 0.1 * jax.random.normal(kg, (C_out,), dtype=jnp.float32)
    beta = 0.1 * jax.random.normal(kbt, (C_out,), dtype=jnp.float32)

    # Kernels feed the MXU bf16 x/w with f32 accumulation; compare against a
    # reference that sees the same bf16-rounded inputs.
    w_bf = w.astype(jnp.bfloat16).astype(jnp.float32)

    # Case 1: multi-tile path — N=2, L=512, forced 128-wide tiles -> grid (2, 4).
    x1 = jax.random.normal(kx, (2, C_in, 512), dtype=jnp.float32)
    out1 = jax.block_until_ready(
        downsampling_layer(x1, w, b, gamma, beta, padding=PAD, tile_l=128))
    ref1 = _reference(x1.astype(jnp.bfloat16).astype(jnp.float32), w_bf,
                      b, gamma, beta, padding=PAD)
    assert out1.shape == (2, C_out, 512), out1.shape
    assert jnp.allclose(out1, ref1, atol=2e-4, rtol=2e-4), \
        float(jnp.max(jnp.abs(out1 - ref1)))

    # Case 2: default tile selection + ragged length (masked BN stats, L_out=100).
    x2 = jax.random.normal(kx2, (2, C_in, 100), dtype=jnp.float32)
    out2 = jax.block_until_ready(
        downsampling_layer(x2, w, b, gamma, beta, padding=PAD))
    ref2 = _reference(x2.astype(jnp.bfloat16).astype(jnp.float32), w_bf,
                      b, gamma, beta, padding=PAD)
    assert out2.shape == (2, C_out, 100), out2.shape
    assert jnp.allclose(out2, ref2, atol=2e-4, rtol=2e-4), \
        float(jnp.max(jnp.abs(out2 - ref2)))

    print("KERNEL_OK")
</pallas_src>

<mosaic_0001>
module attributes {stable_mosaic.version = 11 : i64} {
  func.func @_stats_kernel(%arg0: i32, %arg1: i32, %arg2: memref<1x4x128xbf16, #tpu.memory_space<vmem>>, %arg3: memref<1x4x128xbf16, #tpu.memory_space<vmem>>, %arg4: memref<8x60xbf16, #tpu.memory_space<vmem>>, %arg5: memref<1x1x8x2xf32, #tpu.memory_space<vmem>>) attributes {dimension_semantics = [#tpu.dimension_semantics<parallel>, #tpu.dimension_semantics<parallel>], iteration_bounds = array<i64: 2, 4>, scalar_prefetch = 0 : i64, scratch_operands = 0 : i64, tpu.core_type = #tpu.core_type<tc>, window_params = [{transform_indices = @transform_0, window_bounds = array<i64: 1, 4, 128>}, {transform_indices = @transform_1, window_bounds = array<i64: 1, 4, 128>}, {pipeline_mode = #tpu.pipeline_mode<synchronous>, transform_indices = @transform_2, window_bounds = array<i64: 8, 60>}, {transform_indices = @transform_3, window_bounds = array<i64: 1, 1, 8, 2>}]} {
    %c0 = arith.constant 0 : index
    %c0_0 = arith.constant 0 : index
    %c0_1 = arith.constant 0 : index
    %0 = vector.load %arg2[%c0, %c0_0, %c0_1] : memref<1x4x128xbf16, #tpu.memory_space<vmem>>, vector<1x4x128xbf16>
    %1 = vector.shape_cast %0 : vector<1x4x128xbf16> to vector<4x128xbf16>
    %c0_2 = arith.constant 0 : index
    %c0_3 = arith.constant 0 : index
    %c0_4 = arith.constant 0 : index
    %2 = vector.load %arg3[%c0_2, %c0_3, %c0_4] : memref<1x4x128xbf16, #tpu.memory_space<vmem>>, vector<1x4x128xbf16>
    %3 = vector.shape_cast %2 : vector<1x4x128xbf16> to vector<4x128xbf16>
    %4 = tpu.concatenate %1, %3 in 1 : vector<4x128xbf16>, vector<4x128xbf16> -> vector<4x256xbf16>
    %5 = vector.extract_strided_slice %4 {offsets = [0, 0], sizes = [4, 128], strides = [1, 1]} : vector<4x256xbf16> to vector<4x128xbf16>
    %6 = vector.extract_strided_slice %4 {offsets = [0, 1], sizes = [4, 128], strides = [1, 1]} : vector<4x256xbf16> to vector<4x128xbf16>
    %7 = vector.extract_strided_slice %4 {offsets = [0, 2], sizes = [4, 128], strides = [1, 1]} : vector<4x256xbf16> to vector<4x128xbf16>
    %8 = vector.extract_strided_slice %4 {offsets = [0, 3], sizes = [4, 128], strides = [1, 1]} : vector<4x256xbf16> to vector<4x128xbf16>
    %9 = vector.extract_strided_slice %4 {offsets = [0, 4], sizes = [4, 128], strides = [1, 1]} : vector<4x256xbf16> to vector<4x128xbf16>
    %10 = vector.extract_strided_slice %4 {offsets = [0, 5], sizes = [4, 128], strides = [1, 1]} : vector<4x256xbf16> to vector<4x128xbf16>
    %11 = vector.extract_strided_slice %4 {offsets = [0, 6], sizes = [4, 128], strides = [1, 1]} : vector<4x256xbf16> to vector<4x128xbf16>
    %12 = vector.extract_strided_slice %4 {offsets = [0, 7], sizes = [4, 128], strides = [1, 1]} : vector<4x256xbf16> to vector<4x128xbf16>
    %13 = vector.extract_strided_slice %4 {offsets = [0, 8], sizes = [4, 128], strides = [1, 1]} : vector<4x256xbf16> to vector<4x128xbf16>
    %14 = vector.extract_strided_slice %4 {offsets = [0, 9], sizes = [4, 128], strides = [1, 1]} : vector<4x256xbf16> to vector<4x128xbf16>
    %15 = vector.extract_strided_slice %4 {offsets = [0, 10], sizes = [4, 128], strides = [1, 1]} : vector<4x256xbf16> to vector<4x128xbf16>
    %16 = vector.extract_strided_slice %4 {offsets = [0, 11], sizes = [4, 128], strides = [1, 1]} : vector<4x256xbf16> to vector<4x128xbf16>
    %17 = vector.extract_strided_slice %4 {offsets = [0, 12], sizes = [4, 128], strides = [1, 1]} : vector<4x256xbf16> to vector<4x128xbf16>
    %18 = vector.extract_strided_slice %4 {offsets = [0, 13], sizes = [4, 128], strides = [1, 1]} : vector<4x256xbf16> to vector<4x128xbf16>
    %19 = vector.extract_strided_slice %4 {offsets = [0, 14], sizes = [4, 128], strides = [1, 1]} : vector<4x256xbf16> to vector<4x128xbf16>
    %20 = tpu.concatenate %5, %6, %7, %8, %9, %10, %11, %12, %13, %14, %15, %16, %17, %18, %19 in 0 : vector<4x128xbf16>, vector<4x128xbf16>, vector<4x128xbf16>, vector<4x128xbf16>, vector<4x128xbf16>, vector<4x128xbf16>, vector<4x128xbf16>, vector<4x128xbf16>, vector<4x128xbf16>, vector<4x128xbf16>, vector<4x128xbf16>, vector<4x128xbf16>, vector<4x128xbf16>, vector<4x128xbf16>, vector<4x128xbf16> -> vector<60x128xbf16>
    %c0_5 = arith.constant 0 : index
    %c0_6 = arith.constant 0 : index
    %21 = vector.load %arg4[%c0_5, %c0_6] : memref<8x60xbf16, #tpu.memory_space<vmem>>, vector<8x60xbf16>
    %cst = arith.constant dense<0.000000e+00> : vector<8x128xf32>
    %22 = tpu.matmul %21, %20, %cst {dimension_numbers = #tpu.dot_dimension_numbers<[1], [0], [0], [1], [0, 0, 1, 1], [], []>} : vector<8x60xbf16>, vector<60x128xbf16>, vector<8x128xf32> -> vector<8x128xf32>
    %23 = tpu.iota {dimensions = array<i32: 1>} : vector<1x128xi32>
    %c128_i32 = arith.constant 128 : i32
    %24 = arith.muli %arg1, %c128_i32 : i32
    %25 = vector.broadcast %24 : i32 to vector<1x128xi32>
    %26 = arith.addi %23, %25 : vector<1x128xi32>
    %c512_i32 = arith.constant 512 : i32
    %27 = vector.broadcast %c512_i32 : i32 to vector<1x128xi32>
    %28 = arith.cmpi slt, %26, %27 : vector<1x128xi32>
    %29 = arith.extui %28 : vector<1x128xi1> to vector<1x128xi32>
    %30 = arith.sitofp %29 : vector<1x128xi32> to vector<1x128xf32>
    %31 = vector.broadcast %30 : vector<1x128xf32> to vector<8x128xf32>
    %32 = arith.mulf %22, %31 : vector<8x128xf32>
    %cst_7 = arith.constant dense<0.000000e+00> : vector<8xf32>
    %33 = vector.multi_reduction <add>, %32, %cst_7 [1] : vector<8x128xf32> to vector<8xf32>
    %34 = vector.shape_cast %33 : vector<8xf32> to vector<8x1xf32>
    %35 = arith.mulf %32, %22 : vector<8x128xf32>
    %cst_8 = arith.constant dense<0.000000e+00> : vector<8xf32>
    %36 = vector.multi_reduction <add>, %35, %cst_8 [1] : vector<8x128xf32> to vector<8xf32>
    %37 = vector.shape_cast %36 : vector<8xf32> to vector<8x1xf32>
    %38 = tpu.concatenate %34, %37 in 1 : vector<8x1xf32>, vector<8x1xf32> -> vector<8x2xf32>
    %c0_9 = arith.constant 0 : index
    %c0_10 = arith.constant 0 : index
    %c0_11 = arith.constant 0 : index
    %c0_12 = arith.constant 0 : index
    %39 = vector.load %arg5[%c0_9, %c0_10, %c0_11, %c0_12] : memref<1x1x8x2xf32, #tpu.memory_space<vmem>>, vector<1x1x8x2xf32>
    %40 = vector.shape_cast %39 : vector<1x1x8x2xf32> to vector<8x2xf32>
    %41 = vector.shape_cast %38 : vector<8x2xf32> to vector<1x1x8x2xf32>
    tpu.vector_store %arg5[%c0_9, %c0_10, %c0_11, %c0_12], %41 {strides = array<i32>} : memref<1x1x8x2xf32, #tpu.memory_space<vmem>>, vector<1x1x8x2xf32>,
    return
  }
  func.func @transform_0(%arg0: i32, %arg1: i32) -> (i32, i32, i32) {
    %c0_i32 = arith.constant 0 : i32
    %c0_i32_0 = arith.constant 0 : i32
    return %arg0, %c0_i32, %arg1 : i32, i32, i32
  }
  func.func @transform_1(%arg0: i32, %arg1: i32) -> (i32, i32, i32) {
    %c1_i32 = arith.constant 1 : i32
    %0 = arith.addi %arg1, %c1_i32 : i32
    %c1_i32_0 = arith.constant 1 : i32
    %1 = arith.muli %0, %c1_i32_0 : i32
    %c0_i32 = arith.constant 0 : i32
    %c0_i32_1 = arith.constant 0 : i32
    return %arg0, %c0_i32, %1 : i32, i32, i32
  }
  func.func @transform_2(%arg0: i32, %arg1: i32) -> (i32, i32) {
    %c0_i32 = arith.constant 0 : i32
    %c0_i32_0 = arith.constant 0 : i32
    %c0_i32_1 = arith.constant 0 : i32
    return %c0_i32, %c0_i32_0 : i32, i32
  }
  func.func @transform_3(%arg0: i32, %arg1: i32) -> (i32, i32, i32, i32) {
    %c0_i32 = arith.constant 0 : i32
    %c0_i32_0 = arith.constant 0 : i32
    %c0_i32_1 = arith.constant 0 : i32
    return %arg0, %arg1, %c0_i32, %c0_i32_0 : i32, i32, i32, i32
  }
}

module attributes {stable_mosaic.version = 11 : i64} {
  func.func @_bn_act_kernel(%arg0: i32, %arg1: i32, %arg2: memref<1x4x128xbf16, #tpu.memory_space<vmem>>, %arg3: memref<1x4x128xbf16, #tpu.memory_space<vmem>>, %arg4: memref<8x60xbf16, #tpu.memory_space<vmem>>, %arg5: memref<8x2xf32, #tpu.memory_space<vmem>>, %arg6: memref<1x8x128xf32, #tpu.memory_space<vmem>>) attributes {dimension_semantics = [#tpu.dimension_semantics<parallel>, #tpu.dimension_semantics<parallel>], iteration_bounds = array<i64: 2, 4>, scalar_prefetch = 0 : i64, scratch_operands = 0 : i64, tpu.core_type = #tpu.core_type<tc>, window_params = [{transform_indices = @transform_0, window_bounds = array<i64: 1, 4, 128>}, {transform_indices = @transform_1, window_bounds = array<i64: 1, 4, 128>}, {pipeline_mode = #tpu.pipeline_mode<synchronous>, transform_indices = @transform_2, window_bounds = array<i64: 8, 60>}, {pipeline_mode = #tpu.pipeline_mode<synchronous>, transform_indices = @transform_3, window_bounds = array<i64: 8, 2>}, {transform_indices = @transform_4, window_bounds = array<i64: 1, 8, 128>}]} {
    %c0 = arith.constant 0 : index
    %c0_0 = arith.constant 0 : index
    %c0_1 = arith.constant 0 : index
    %0 = vector.load %arg2[%c0, %c0_0, %c0_1] : memref<1x4x128xbf16, #tpu.memory_space<vmem>>, vector<1x4x128xbf16>
    %1 = vector.shape_cast %0 : vector<1x4x128xbf16> to vector<4x128xbf16>
    %c0_2 = arith.constant 0 : index
    %c0_3 = arith.constant 0 : index
    %c0_4 = arith.constant 0 : index
    %2 = vector.load %arg3[%c0_2, %c0_3, %c0_4] : memref<1x4x128xbf16, #tpu.memory_space<vmem>>, vector<1x4x128xbf16>
    %3 = vector.shape_cast %2 : vector<1x4x128xbf16> to vector<4x128xbf16>
    %4 = tpu.concatenate %1, %3 in 1 : vector<4x128xbf16>, vector<4x128xbf16> -> vector<4x256xbf16>
    %5 = vector.extract_strided_slice %4 {offsets = [0, 0], sizes = [4, 128], strides = [1, 1]} : vector<4x256xbf16> to vector<4x128xbf16>
    %6 = vector.extract_strided_slice %4 {offsets = [0, 1], sizes = [4, 128], strides = [1, 1]} : vector<4x256xbf16> to vector<4x128xbf16>
    %7 = vector.extract_strided_slice %4 {offsets = [0, 2], sizes = [4, 128], strides = [1, 1]} : vector<4x256xbf16> to vector<4x128xbf16>
    %8 = vector.extract_strided_slice %4 {offsets = [0, 3], sizes = [4, 128], strides = [1, 1]} : vector<4x256xbf16> to vector<4x128xbf16>
    %9 = vector.extract_strided_slice %4 {offsets = [0, 4], sizes = [4, 128], strides = [1, 1]} : vector<4x256xbf16> to vector<4x128xbf16>
    %10 = vector.extract_strided_slice %4 {offsets = [0, 5], sizes = [4, 128], strides = [1, 1]} : vector<4x256xbf16> to vector<4x128xbf16>
    %11 = vector.extract_strided_slice %4 {offsets = [0, 6], sizes = [4, 128], strides = [1, 1]} : vector<4x256xbf16> to vector<4x128xbf16>
    %12 = vector.extract_strided_slice %4 {offsets = [0, 7], sizes = [4, 128], strides = [1, 1]} : vector<4x256xbf16> to vector<4x128xbf16>
    %13 = vector.extract_strided_slice %4 {offsets = [0, 8], sizes = [4, 128], strides = [1, 1]} : vector<4x256xbf16> to vector<4x128xbf16>
    %14 = vector.extract_strided_slice %4 {offsets = [0, 9], sizes = [4, 128], strides = [1, 1]} : vector<4x256xbf16> to vector<4x128xbf16>
    %15 = vector.extract_strided_slice %4 {offsets = [0, 10], sizes = [4, 128], strides = [1, 1]} : vector<4x256xbf16> to vector<4x128xbf16>
    %16 = vector.extract_strided_slice %4 {offsets = [0, 11], sizes = [4, 128], strides = [1, 1]} : vector<4x256xbf16> to vector<4x128xbf16>
    %17 = vector.extract_strided_slice %4 {offsets = [0, 12], sizes = [4, 128], strides = [1, 1]} : vector<4x256xbf16> to vector<4x128xbf16>
    %18 = vector.extract_strided_slice %4 {offsets = [0, 13], sizes = [4, 128], strides = [1, 1]} : vector<4x256xbf16> to vector<4x128xbf16>
    %19 = vector.extract_strided_slice %4 {offsets = [0, 14], sizes = [4, 128], strides = [1, 1]} : vector<4x256xbf16> to vector<4x128xbf16>
    %20 = tpu.concatenate %5, %6, %7, %8, %9, %10, %11, %12, %13, %14, %15, %16, %17, %18, %19 in 0 : vector<4x128xbf16>, vector<4x128xbf16>, vector<4x128xbf16>, vector<4x128xbf16>, vector<4x128xbf16>, vector<4x128xbf16>, vector<4x128xbf16>, vector<4x128xbf16>, vector<4x128xbf16>, vector<4x128xbf16>, vector<4x128xbf16>, vector<4x128xbf16>, vector<4x128xbf16>, vector<4x128xbf16>, vector<4x128xbf16> -> vector<60x128xbf16>
    %c0_5 = arith.constant 0 : index
    %c0_6 = arith.constant 0 : index
    %21 = vector.load %arg4[%c0_5, %c0_6] : memref<8x60xbf16, #tpu.memory_space<vmem>>, vector<8x60xbf16>
    %cst = arith.constant dense<0.000000e+00> : vector<8x128xf32>
    %22 = tpu.matmul %21, %20, %cst {dimension_numbers = #tpu.dot_dimension_numbers<[1], [0], [0], [1], [0, 0, 1, 1], [], []>} : vector<8x60xbf16>, vector<60x128xbf16>, vector<8x128xf32> -> vector<8x128xf32>
    %c0_7 = arith.constant 0 : index
    %c0_8 = arith.constant 0 : index
    %23 = vector.load %arg5[%c0_7, %c0_8] : memref<8x2xf32, #tpu.memory_space<vmem>>, vector<8x1xf32>
    %24 = vector.broadcast %23 : vector<8x1xf32> to vector<8x128xf32>
    %25 = arith.mulf %22, %24 : vector<8x128xf32>
    %c0_9 = arith.constant 0 : index
    %c1 = arith.constant 1 : index
    %26 = vector.load %arg5[%c0_9, %c1] : memref<8x2xf32, #tpu.memory_space<vmem>>, vector<8x1xf32>
    %27 = vector.broadcast %26 : vector<8x1xf32> to vector<8x128xf32>
    %28 = arith.addf %25, %27 : vector<8x128xf32>
    %cst_10 = arith.constant 1.000000e-01 : f32
    %29 = vector.broadcast %cst_10 : f32 to vector<8x128xf32>
    %30 = arith.mulf %29, %28 : vector<8x128xf32>
    %31 = arith.maximumf %28, %30 : vector<8x128xf32>
    %c0_11 = arith.constant 0 : index
    %c0_12 = arith.constant 0 : index
    %c0_13 = arith.constant 0 : index
    %32 = vector.load %arg6[%c0_11, %c0_12, %c0_13] : memref<1x8x128xf32, #tpu.memory_space<vmem>>, vector<1x8x128xf32>
    %33 = vector.shape_cast %32 : vector<1x8x128xf32> to vector<8x128xf32>
    %34 = vector.shape_cast %31 : vector<8x128xf32> to vector<1x8x128xf32>
    tpu.vector_store %arg6[%c0_11, %c0_12, %c0_13], %34 {strides = array<i32>} : memref<1x8x128xf32, #tpu.memory_space<vmem>>, vector<1x8x128xf32>,
    return
  }
  func.func @transform_0(%arg0: i32, %arg1: i32) -> (i32, i32, i32) {
    %c0_i32 = arith.constant 0 : i32
    %c0_i32_0 = arith.constant 0 : i32
    return %arg0, %c0_i32, %arg1 : i32, i32, i32
  }
  func.func @transform_1(%arg0: i32, %arg1: i32) -> (i32, i32, i32) {
    %c1_i32 = arith.constant 1 : i32
    %0 = arith.addi %arg1, %c1_i32 : i32
    %c1_i32_0 = arith.constant 1 : i32
    %1 = arith.muli %0, %c1_i32_0 : i32
    %c0_i32 = arith.constant 0 : i32
    %c0_i32_1 = arith.constant 0 : i32
    return %arg0, %c0_i32, %1 : i32, i32, i32
  }
  func.func @transform_2(%arg0: i32, %arg1: i32) -> (i32, i32) {
    %c0_i32 = arith.constant 0 : i32
    %c0_i32_0 = arith.constant 0 : i32
    %c0_i32_1 = arith.constant 0 : i32
    return %c0_i32, %c0_i32_0 : i32, i32
  }
  func.func @transform_3(%arg0: i32, %arg1: i32) -> (i32, i32) {
    %c0_i32 = arith.constant 0 : i32
    %c0_i32_0 = arith.constant 0 : i32
    %c0_i32_1 = arith.constant 0 : i32
    return %c0_i32, %c0_i32_0 : i32, i32
  }
  func.func @transform_4(%arg0: i32, %arg1: i32) -> (i32, i32, i32) {
    %c0_i32 = arith.constant 0 : i32
    %c0_i32_0 = arith.constant 0 : i32
    return %arg0, %c0_i32, %arg1 : i32, i32, i32
  }
}

</mosaic_0001>

<bundles_post_ra>
// kernel: downsampling_layer.3
= control target key start
LH: loop header
LB: loop body
LE: loop exit
PB: predicated region body
PF: predicated region fallthrough
CT: control target
= control target key end

     0   :  { %9 = vsyncpa [#allocation3], 0  ;;  %s982_s0 = inlined_call_operand.vmem [shape: bf16[2,4,640], index: 0, kind: input, shape index: {}, may-alias: {0,1}]   ;;  %s983_s1 = inlined_call_operand.vmem [shape: bf16[2,4,640], index: 1, kind: input, shape index: {}, may-alias: {0,1}]   ;;  %s984_s2 = inlined_call_operand.vmem [shape: bf16[8,60], index: 2, kind: input, shape index: {}]   ;;  %s985_s3 = inlined_call_operand.vmem [shape: f32[8,2], index: 3, kind: input, shape index: {}]   ;;  %s986_s4 = inlined_call_operand.hbm [shape: f32[2,8,512], index: 4, kind: output, shape index: {}]  }
   0x1   :  { %11 = vsyncpa [#allocation3 + $0x1], 0  ;;  %s822_s15 = smov 0   ;;  %s824_s16 = smov 0  }
   0x2   :  { %s826_s17 = smov 0   ;;  %s828_s18 = smov 0  }
   0x3   :  { %s830_s19 = smov 0   ;;  %s832_s20 = smov 0  }
   0x4   :  { %s834_s21 = smov 0   ;;  %s836_s22 = smov 0  }
   0x5 LB: > { %s560_s23 = sadd.s32 4294967295, %s776_s22   ;;  %s561_s24 = sadd.s32 4294967294, %s776_s22   ;;  %s776_s22 = sphi %s836_s22, %s17_s22   ;;  %s772_s21 = sphi %s834_s21, %s1001_s21   ;;  %s768_s20 = sphi %s832_s20, %s1000_s20   ;;  %s764_s19 = sphi %s830_s19, %s999_s19   ;;  %s760_s18 = sphi %s828_s18, %s998_s18   ;;  %s756_s17 = sphi %s826_s17, %s997_s17   ;;  %s752_s16 = sphi %s824_s16, %s996_s16   ;;  %s748_s15 = sphi %s822_s15, %s995_s15  }
   0x6   : > { %s26_s25 = sadd.s32 1, %s768_s20  ;;  %s29_s26 = sadd.s32 1, %s772_s21 }
   0x7   : > { %p27_p0 = scmp.ge.s32.totalorder %s26_s25, 4  ;;  %p148_p1 = scmp.ne.s32.totalorder %s756_s17, %s752_s16 }
   0x8   : > { %p149_p2 = scmp.eq.s32.totalorder %s560_s23, 7  ;;  %p154_p5 = scmp.ne.s32.totalorder %s752_s16, %s748_s15 }
   0x9   : > { %s1003_s25 = smov (%p27_p0, %s26_s25), 0  ;;  %s1005_s26 = smov (!%p27_p0, %s29_s26), %s772_s21 }
   0xa   : > { %989 = sst [smem:[#allocation5_spill]] %s1003_s25  ;;  %s134_s27 = ssub.s32 %s768_s20, %s1003_s25 }
   0xb   : > { %p873_p3 = por %p149_p2, %p148_p1  ;;  %p31_p4 = scmp.ge.s32.totalorder %s1005_s26, 2 }
   0xc   : > { %p155_p6 = scmp.eq.s32.totalorder %s561_s24, 7  ;;  %p564_p7 = scmp.ge.s32.totalorder %s776_s22, 1 }
   0xd   : > { %s1007_s26 = smov (%p31_p4, %s1005_s26), 0  ;;  %p203_p9 = scmp.lt.s32.totalorder %s776_s22, 9 }
   0xe   : > { %991 = sst [smem:[#allocation6_spill]] %s1007_s26  ;;  %p882_p8 = por %p155_p6, %p154_p5 }
   0xf   : > { %s133_s30 = ssub.s32 %s772_s21, %s1007_s26  ;;  %s138_s5 = sadd.s32 1, %s756_s17 }
  0x10   : > { %s135_s6 = sor.u32 %s134_s27, %s133_s30  ;;  %p204_p10 = pnand %p564_p7, %p203_p9 }
  0x11   : > { %p136_p11 = scmp.eq.s32.totalorder %s135_s6, 0  ;;  %p241_p12 = scmp.lt.s32.totalorder (!%p204_p10), %s764_s19, 1 }
  0x12   : > { %207 = sbr.rel (%p204_p10) target bundleno = 418 (0x1a2), region = 36  ;;  %s249_s8 = sadd.s32 (!%p204_p10), 1, %s760_s18 }
  0x13   : > { %s891_s7 = scalar_select %p136_p11, %s756_s17, %s138_s5  }
  0x14   : > { %p252_p13 = scmp.lt.s32.totalorder (!%p204_p10), %s249_s8, 4  ;;  %p243_p0 = scmp.lt.s32.totalorder (!%p204_p10), %s760_s18, 4 }
  0x15   : > { %s778_s27 = smov (!%p204_p10), 120   ;;  %s783_s26 = smov (!%p204_p10), 119  }
  0x16   : > { %s787_s13 = smov (!%p204_p10), 123   ;;  %s788_s14 = smov (!%p204_p10), 122  }
  0x17   : > { %s242_s9 = scalar_select %p241_p12, %s764_s19, 1  ;;  %v780_v3 = vmov 0.0   ;;  %vm791_vm0 = vmmov 0   ;;  %v792_v9 = vmov 0   ;;  %v793_v10 = vmov 1   ;;  %v433_v11 = vld [vmem:[%s985_s3] sm:$0xff] }
  0x18   : > { %s1009_s8 = smov (!%p252_p13, %s249_s8), 4  ;;  %579 = vmatprep.subr.bf16.mxu0 %v780_v3  ;;  %587 = vmatprep.mubr.msk.bf16.mxu0 %vm791_vm0, %v780_v3  ;;  %vm346_vm1 = vcmask 941056   ;;  %vm340_vm2 = vcmask 949248   ;;  %vm352_vm3 = vcmask 932864   ;;  %vm354_vm4 = vcmask 1041408  }
  0x19   : > { %s591_s10 = smul.u32 5, %s242_s9  ;;  %s779_s9 = smov 116   ;;  %681 = vset.pattern.permute.xlu0 %v792_v9  ;;  %682 = vset.pattern.permute.xlu1 %v793_v10  ;;  %vm358_vm5 = vcmask 1043456   ;;  %vm361_vm6 = vcmask 1045504   ;;  %vm322_vm7 = vcmask 973824   ;;  %vm328_vm8 = vcmask 965632  }
  0x1a   : > { %s244_s24 = scalar_select %p243_p0, %s760_s18, 4  ;;  %vm316_vm9 = vcmask 982016   ;;  %vm334_vm10 = vcmask 957440   ;;  %vm298_vm11 = vcmask 1006592   ;;  %vm304_vm12 = vcmask 998400  }
  0x1b   : > { %s255_s11 = sadd.s32 %s591_s10, %s1009_s8  ;;  %s781_s8 = smov 115   ;;  %vm292_vm13 = vcmask 1014784   ;;  %vm310_vm14 = vcmask 990208   ;;  %vm270_vm15 = vcmask 1039360   ;;  %vm278_vm0 = vcmask 1031168  }
  0x1c   : > { %s567_s12 = sshll.u32 %s255_s11, 1  ;;  %s246_s30 = sadd.s32 %s591_s10, %s244_s24 }
  0x1d   : > { %s257_s23 = scalar_lea.vmem %s983_s1, %s567_s12  ;;  %s566_s5 = sshll.u32 %s246_s30, 1 }
  0x1e   : > { %v261_v0 = vld [vmem:[%s257_s23] sm:$0x3]  ;;  %s248_s25 = scalar_lea.vmem %s982_s0, %s566_s5  ;;  %s784_s10 = smov 118  }
  0x1f   : > { %314 = vrot.lane.b32.xlu1 %v261_v0, %s778_s27  ;;  %v904_v1 = vld [vmem:[%s248_s25] sm:$0x3]  ;;  %v265_v4 = vrot.slane %v261_v0, 6  ;;  %v273_v5 = vrot.slane %v261_v0, 4  ;;  %s782_s25 = smov 114   ;;  %v281_v7 = vrot.slane %v261_v0, 2 }
  0x20   : > { %336 = vrot.lane.b32.xlu0 %v904_v1, %s779_s9  ;;  %v264_v2 = vrot.slane %v904_v1, 6  ;;  %v272_v6 = vrot.slane %v904_v1, 4  ;;  %v280_v8 = vrot.slane %v904_v1, 2  ;;  %s785_s11 = smov 117   ;;  %s786_s12 = smov 124  }
  0x21   : > { %s789_s23 = smov 121   ;;  %s790_s24 = smov 127  }
  0x22   : > { %s795_s30 = smov 125  }
  0x23   : > { %342 = vrot.lane.b32.xlu1 %v264_v2, %s781_s8 }
  0x24   : > { %338 = vrot.lane.b32.xlu0 %v261_v0, %s779_s9 }
  0x27   : > { %344 = vrot.lane.b32.xlu1 %v265_v4, %s781_s8 }
  0x28   : > { %312 = vrot.lane.b32.xlu0 %v904_v1, %s778_s27  ;;  %s794_s27 = smov 126  }
  0x2b   : > { %350 = vrot.lane.b32.xlu1 %v273_v5, %s782_s25 }
  0x2c   : > { %348 = vrot.lane.b32.xlu0 %v272_v6, %s782_s25  ;;  %s238_s25 = sand.u32 1, %s752_s16  }
  0x2f   : > { %320 = vrot.lane.b32.xlu1 %v265_v4, %s783_s26 }
  0x30   : > { %318 = vrot.lane.b32.xlu0 %v264_v2, %s783_s26  ;;  %s565_s26 = sshll.u32 %s238_s25, 3 }
  0x33   : > { %326 = vrot.lane.b32.xlu1 %v273_v5, %s784_s10 }
  0x34   : > { %324 = vrot.lane.b32.xlu0 %v272_v6, %s784_s10  ;;  %s570_s10 = sshll.u32 %s764_s19, 2  ;;  %s449_s19 = scalar_lea.sflag [#allocation3], %s238_s25 }
  0x37   : > { %332 = vrot.lane.b32.xlu1 %v281_v7, %s785_s11 }
  0x38   : > { %330 = vrot.lane.b32.xlu0 %v280_v8, %s785_s11  ;;  %s460_s11 = sadd.s32 %s760_s18, %s570_s10  ;;  %s796_s18 = smov [#allocation2]  }
  0x39   : > { %s688_s5 = sshll.u32 %s796_s18, 4  ;;  %s689_s5 = int_to_ptr.vmem [resolvable:$false] %s688_s5 }
  0x3a   : > { %s690_s6 = scalar_lea.vmem %s689_s5, 256 }
  0x3b   : > { %290 = vrot.lane.b32.xlu1 %v261_v0, %s786_s12 }
  0x3c   : > { %288 = vrot.lane.b32.xlu0 %v904_v1, %s786_s12  ;;  %s571_s12 = sshll.u32 %s460_s11, 7 }
  0x3f   : > { %296 = vrot.lane.b32.xlu1 %v265_v4, %s787_s13 }
  0x40   : > { %294 = vrot.lane.b32.xlu0 %v264_v2, %s787_s13  ;;  %s240_s13 = scalar_lea.vmem [#allocation2], %s565_s26 }
  0x43   : > { %302 = vrot.lane.b32.xlu1 %v273_v5, %s788_s14 }
  0x44   : > { %300 = vrot.lane.b32.xlu0 %v272_v6, %s788_s14  ;;  %s464_s14 = sshll.u32 %s240_s13, 4  ;;  %s465_s14 = int_to_ptr.vmem [resolvable:$true] %s464_s14 }
  0x45   : > { %p691_p5 = scmp.lt.s32.totalorder %s465_s14, %s689_s5 }
  0x47   : > { %308 = vrot.lane.b32.xlu1 %v281_v7, %s789_s23 }
  0x48   : > { %306 = vrot.lane.b32.xlu0 %v280_v8, %s789_s23 }
  0x4b   : > { %268 = vrot.lane.b32.xlu1 %v265_v4, %s790_s24 }
  0x4c   : > { %266 = vrot.lane.b32.xlu0 %v264_v2, %s790_s24 }
  0x4f   : > { %276 = vrot.lane.b32.xlu1 %v273_v5, %s794_s27 }
  0x50   : > { %274 = vrot.lane.b32.xlu0 %v272_v6, %s794_s27  ;;  %s462_s27 = scalar_lea.hbm %s986_s4, %s571_s12 }
  0x53   : > { %284 = vrot.lane.b32.xlu1 %v281_v7, %s795_s30 }
  0x54   : > { %282 = vrot.lane.b32.xlu0 %v280_v8, %s795_s30  ;;  %s684_s30 = scalar_lea.vmem %s465_s14, 128 }
  0x55   : > { %p685_p1 = scmp.ne.s32.totalorder %s465_s14, %s684_s30  ;;  %p692_p6 = scmp.lt.s32.totalorder %s690_s6, %s684_s30 }
  0x57   : > { %441 = vperm.xlu1 %682, %v433_v11   ;;  %p686_p2 = pnand %p685_p1, %p873_p3  ;;  %p693_p7 = por %p692_p6, %p691_p5 }
  0x58   : > { %436 = vperm.xlu0 %681, %v433_v11  }
  0x59   : > { %p687_p4 = pneg %p686_p2 }
  0x5b   : > { %p694_p9 = pnand %p693_p7, %p687_p4 }
  0x5c   : > { %683 = vset.pattern.permute.xlu0 %v793_v10 }
  0x91   : > { %v315_v12 = vpop.permute.xlu1 %314 }
  0x92   : > { %v337_v13 = vpop.permute.xlu0 %336 }
  0x95   : > { %v343_v14 = vpop.permute.xlu1 %342 }
  0x96   : > { %v339_v15 = vpop.permute.xlu0 %338 }
  0x97   : > { %v341_v20 = vsel %vm340_vm2, %v337_v13, %v339_v15  ;;  %vm387_vm2 = vcmask 490496  }
  0x99   : > { %v345_v16 = vpop.permute.xlu1 %344 }
  0x9a   : > { %v313_v17 = vpop.permute.xlu0 %312  ;;  %v347_v18 = vsel %vm346_vm1, %v343_v14, %v345_v16  ;;  %vm286_vm1 = vcmask 1022976  }
  0x9b   : > { %v383_v23 = vsel %vm354_vm4, %v341_v20, %v347_v18  ;;  %v317_v33 = vsel %vm316_vm9, %v313_v17, %v315_v12 }
  0x9d   : > { %v351_v19 = vpop.permute.xlu1 %350 }
  0x9e   : > { %v349_v21 = vpop.permute.xlu0 %348 }
  0x9f   : > { %v353_v22 = vsel %vm352_vm3, %v349_v21, %v351_v19 }
  0xa0   : > { %v385_v24 = vsel %vm358_vm5, %v383_v23, %v353_v22 }
  0xa1   : > { %v321_v25 = vpop.permute.xlu1 %320  ;;  %v391_v26 = vsel %vm361_vm6, %v385_v24, 0 }
  0xa2   : > { %v319_v27 = vpop.permute.xlu0 %318  ;;  %580 = vmatpush3.bf16.msra.mxu0 %v391_v26 }
  0xa3   : > { %581 = vmatprep.subr.bf16.mxu0 %v780_v3  ;;  %v323_v30 = vsel %vm322_vm7, %v319_v27, %v321_v25 }
  0xa4   : > { %v375_v34 = vsel %vm354_vm4, %v317_v33, %v323_v30 }
  0xa5   : > { %v327_v28 = vpop.permute.xlu1 %326 }
  0xa6   : > { %v325_v29 = vpop.permute.xlu0 %324 }
  0xa7   : > { %v329_v31 = vsel %vm328_vm8, %v325_v29, %v327_v28 }
  0xa8   : > { %v377_v37 = vsel %vm358_vm5, %v375_v34, %v329_v31 }
  0xa9   : > { %v333_v32 = vpop.permute.xlu1 %332 }
  0xaa   : > { %v331_v35 = vpop.permute.xlu0 %330 }
  0xab   : > { %v335_v36 = vsel %vm334_vm10, %v331_v35, %v333_v32 }
  0xac   : > { %v379_v38 = vsel %vm361_vm6, %v377_v37, %v335_v36 }
  0xad   : > { %v291_v39 = vpop.permute.xlu1 %290  ;;  %582 = vmatpush3.bf16.msra.mxu0 %v379_v38 }
  0xae   : > { %v289_v40 = vpop.permute.xlu0 %288  ;;  %583 = vmatprep.subr.bf16.mxu0 %v780_v3 }
  0xaf   : > { %v293_v48 = vsel %vm292_vm13, %v289_v40, %v291_v39 }
  0xb1   : > { %v297_v41 = vpop.permute.xlu1 %296 }
  0xb2   : > { %v295_v42 = vpop.permute.xlu0 %294 }
  0xb3   : > { %v299_v45 = vsel %vm298_vm11, %v295_v42, %v297_v41 }
  0xb4   : > { %v367_v49 = vsel %vm354_vm4, %v293_v48, %v299_v45 }
  0xb5   : > { %v303_v43 = vpop.permute.xlu1 %302 }
  0xb6   : > { %v301_v44 = vpop.permute.xlu0 %300 }
  0xb7   : > { %v305_v46 = vsel %vm304_vm12, %v301_v44, %v303_v43 }
  0xb8   : > { %v369_v52 = vsel %vm358_vm5, %v367_v49, %v305_v46 }
  0xb9   : > { %v309_v47 = vpop.permute.xlu1 %308 }
  0xba   : > { %v307_v50 = vpop.permute.xlu0 %306 }
  0xbb   : > { %v311_v51 = vsel %vm310_vm14, %v307_v50, %v309_v47 }
  0xbc   : > { %v371_v53 = vsel %vm361_vm6, %v369_v52, %v311_v51 }
  0xbd   : > { %v269_v54 = vpop.permute.xlu1 %268  ;;  %584 = vmatpush3.bf16.msra.mxu0 %v371_v53 }
  0xbe   : > { %v267_v55 = vpop.permute.xlu0 %266  ;;  %585 = vmatprep.subr.bf16.mxu0 %v780_v3  ;;  %v386_v3 = vld [vmem:[%s984_s2] sm:$0xf] }
  0xbf   : > { %v271_v58 = vsel %vm270_vm15, %v267_v55, %v269_v54 }
  0xc0   : > { %v357_v61 = vsel %vm354_vm4, %v904_v1, %v271_v58 }
  0xc1   : > { %v277_v56 = vpop.permute.xlu1 %276 }
  0xc2   : > { %v275_v57 = vpop.permute.xlu0 %274 }
  0xc3   : > { %v279_v59 = vsel %vm278_vm0, %v275_v57, %v277_v56 }
  0xc4   : > { %v360_v0 = vsel %vm358_vm5, %v357_v61, %v279_v59 }
  0xc5   : > { %v285_v60 = vpop.permute.xlu1 %284 }
  0xc6   : > { %v283_v62 = vpop.permute.xlu0 %282 }
  0xc7   : > { %v287_v63 = vsel %vm286_vm1, %v283_v62, %v285_v60 }
  0xc8   : > { %v363_v2 = vsel %vm361_vm6, %v360_v0, %v287_v63 }
  0xc9   : > { %586 = vmatpush3.bf16.msra.mxu0 %v363_v2 }
  0xcc   : > { %588 = vmatmul.mubr.msk.bf16.vlgmr.msra.gmra.mxu0 %vm387_vm2, %v386_v3 }
  0xd2   : > { %v442_v1 = vpop.permute.xlu1 %441 }
  0xd3   : > { %v437_v4 = vpop.permute.xlu0 %436 }
 0x18c   : > { %v427_v5 = vpop.f32.mrf.mxu0 }
 0x18d   : > { %v439_v6 = vmul.f32 %v437_v4, %v427_v5 }
 0x18e   : > { %v589_v7 = vpop.f32.mrf.mxu0 }
 0x18f   : > { %v444_v8 = vadd.f32 %v442_v1, %v439_v6 }
 0x190   : > { %v430_v9 = vpop.f32.mrf.mxu0 }
 0x191   : > { %v445_v10 = vmul.f32 0.1, %v444_v8 }
 0x192   : > { %v590_v11 = vpop.f32.mrf.mxu0 }
 0x193   : > { %v446_v12 = vmax.f32 %v444_v8, %v445_v10 }
 0x195   : > { %447 = vst [vmem:[%s240_s13] sm:$0xff] %v446_v12 }
 0x196   : > { %697 = shalt.err (!%p694_p9)
}
 0x197   : > { %s698_s9 = scalar_lea.hbm %s462_s27, 128  ;;  %s702_s26 = scalar_lea.hbm %s986_s4, 1024 }
 0x198   : > { %p699_p10 = scmp.ne.s32.totalorder %s462_s27, %s698_s9  ;;  %p703_p13 = scmp.lt.s32.totalorder %s462_s27, %s986_s4 }
 0x199   : > { %p704_p0 = scmp.lt.s32.totalorder %s702_s26, %s698_s9 }
 0x19a   : > { %p700_p11 = pnand %p699_p10, %p873_p3 }
 0x19b   : > { %p705_p1 = por %p704_p0, %p703_p13 }
 0x19c   : > { %p701_p12 = pneg %p700_p11 }
 0x19e   : > { %p706_p2 = pnand %p705_p1, %p701_p12 }
 0x1a0   : > { %709 = shalt.err (!%p706_p2)
}
 0x1a1   : > { %592 = dma.vmem_to_hbm [thread:$0]  (%p873_p3), %s465_s14, 128, %s462_s27, %s449_s19  }
 0x1a2 PF: > { %p598_p4 = scmp.ge.s32.totalorder %s776_s22, 2  ;;  %s476_s12 = sand.u32 1, %s748_s15  }
 0x1a3   : > { %s477_s13 = scalar_lea.sflag [#allocation3], %s476_s12 }
 0x1a4   : > { %p595_p5 = pnand %p598_p4, %p882_p8 }
 0x1a6   : > { %p596_p6 = pneg %p595_p5 }
 0x1a8   : > { %743 = dma.done.wait (%p596_p6), %s477_s13, 128  }
 0x1a9   : > { %745 = vsyncadd (%p596_p6), %s477_s13, 4294967168  ;;  %s17_s22 = sadd.s32 1, %s776_s22   ;;  %s993_s28 = sld [smem:[#allocation5_spill]] }
 0x1aa   : > { %p14_p7 = scmp.ge.s32.totalorder %s17_s22, 10   ;;  %s994_s14 = sld [smem:[#allocation6_spill]] }
 0x1ab   : > { %s995_s15 = smov %s752_s16  ;;  %s996_s16 = smov %s756_s17 }
 0x1ac   : > { %s997_s17 = smov %s891_s7  ;;  %s998_s18 = smov %s768_s20 }
 0x1ad   : > { %s999_s19 = smov %s772_s21  ;;  %16 = sbr.rel (!%p14_p7) target bundleno = 5 (0x5), region = 74 }
 0x1af   : > { %s1000_s20 = smov %s993_s28 }
 0x1b0   : > { %s1001_s21 = smov %s994_s14 }
 0x1b2   :  { %482 = vsyncpa [#allocation3], 1 }
 0x1b3   :  { %484 = vsyncpa [#allocation3 + $0x1], 1 }

// kernel: downsampling_layer.2
= control target key start
LH: loop header
LB: loop body
LE: loop exit
PB: predicated region body
PF: predicated region fallthrough
CT: control target
= control target key end

     0   :  { %s700_s12 = smov 0   ;;  %s702_s13 = smov 0   ;;  %s796_s0 = inlined_call_operand.vmem [shape: bf16[2,4,640], index: 0, kind: input, shape index: {}, may-alias: {0,1}]   ;;  %s797_s1 = inlined_call_operand.vmem [shape: bf16[2,4,640], index: 1, kind: input, shape index: {}, may-alias: {0,1}]   ;;  %s798_s2 = inlined_call_operand.vmem [shape: bf16[8,60], index: 2, kind: input, shape index: {}]   ;;  %s799_s3 = inlined_call_operand.vmem [shape: f32[2,4,8,2], index: 3, kind: output, shape index: {}]  }
   0x1   :  { %s704_s14 = smov 0   ;;  %s706_s15 = smov 0  }
   0x2   :  { %s708_s16 = smov 0  }
   0x3 LB: > { %s22_s17 = sadd.s32 1, %s654_s14  ;;  %s25_s18 = sadd.s32 1, %s658_s15  ;;  %s662_s16 = sphi %s708_s16, %s13_s16   ;;  %s658_s15 = sphi %s706_s15, %s803_s15   ;;  %s654_s14 = sphi %s704_s14, %s802_s14   ;;  %s650_s13 = sphi %s702_s13, %s801_s13   ;;  %s646_s12 = sphi %s700_s12, %s800_s12  }
   0x4   : > { %p23_p0 = scmp.ge.s32.totalorder %s22_s17, 4  ;;  %p540_p1 = scmp.ge.s32.totalorder %s662_s16, 1 }
   0x5   : > { %p175_p2 = scmp.lt.s32.totalorder %s662_s16, 9 }
   0x6   : > { %s805_s17 = smov (%p23_p0, %s22_s17), 0  ;;  %s807_s18 = smov (!%p23_p0, %s25_s18), %s658_s15 }
   0x7   : > { %p176_p3 = pnand %p540_p1, %p175_p2  ;;  %p27_p4 = scmp.ge.s32.totalorder %s807_s18, 2 }
   0x8   : > { %p214_p5 = scmp.lt.s32.totalorder (!%p176_p3), %s650_s13, 1  ;;  %s222_s19 = sadd.s32 (!%p176_p3), 1, %s646_s12 }
   0x9   : > { %s809_s18 = smov (%p27_p4, %s807_s18), 0  ;;  %179 = sbr.rel (%p176_p3) target bundleno = 531 (0x213), region = 32 }
   0xa   : > { %p225_p6 = scmp.lt.s32.totalorder (!%p176_p3), %s222_s19, 4  ;;  %p216_p7 = scmp.lt.s32.totalorder (!%p176_p3), %s646_s12, 4 }
   0xb   : > { %s664_s27 = smov (!%p176_p3), 120   ;;  %s665_s6 = smov (!%p176_p3), 116  }
   0xc   : > { %s667_s7 = smov (!%p176_p3), 115   ;;  %s668_s8 = smov (!%p176_p3), 114  }
   0xd   : > { %s669_s9 = smov (!%p176_p3), 119   ;;  %s670_s10 = smov (!%p176_p3), 118  }
   0xe   : > { %s811_s13 = smov (!%p214_p5, %s650_s13), 1  ;;  %s813_s19 = smov (!%p225_p6, %s222_s19), 4  ;;  %v666_v3 = vmov 0.0   ;;  %vm677_vm0 = vmmov 0   ;;  %vm327_vm1 = vcmask 941056   ;;  %vm321_vm2 = vcmask 949248  }
   0xf   : > { %s567_s20 = smul.u32 5, %s811_s13  ;;  %555 = vmatprep.subr.bf16.mxu0 %v666_v3  ;;  %s671_s11 = smov 117   ;;  %563 = vmatprep.mubr.msk.bf16.mxu0 %vm677_vm0, %v666_v3  ;;  %vm333_vm3 = vcmask 932864   ;;  %vm335_vm4 = vcmask 1041408   ;;  %vm339_vm5 = vcmask 1043456   ;;  %vm342_vm6 = vcmask 1045504  }
  0x10   : > { %s217_s26 = scalar_select %p216_p7, %s646_s12, 4  ;;  %vm303_vm7 = vcmask 973824   ;;  %vm309_vm8 = vcmask 965632   ;;  %vm297_vm9 = vcmask 982016   ;;  %vm315_vm10 = vcmask 957440  }
  0x11   : > { %s228_s21 = sadd.s32 %s567_s20, %s813_s19  ;;  %s672_s19 = smov 124   ;;  %vm279_vm11 = vcmask 1006592   ;;  %vm285_vm12 = vcmask 998400   ;;  %vm273_vm13 = vcmask 1014784   ;;  %vm291_vm14 = vcmask 990208  }
  0x12   : > { %s542_s22 = sshll.u32 %s228_s21, 1  ;;  %s219_s28 = sadd.s32 %s567_s20, %s217_s26  ;;  %vm251_vm15 = vcmask 1039360   ;;  %vm259_vm0 = vcmask 1031168   ;;  %v367_v63 = vld [vmem:[%s798_s2] sm:$0xf] }
  0x13   : > { %s230_s25 = scalar_lea.vmem %s797_s1, %s542_s22  ;;  %s541_s29 = sshll.u32 %s219_s28, 1 }
  0x14   : > { %v242_v0 = vld [vmem:[%s230_s25] sm:$0x3]  ;;  %s221_s5 = scalar_lea.vmem %s796_s0, %s541_s29  ;;  %s673_s20 = smov 123  }
  0x15   : > { %295 = vrot.lane.b32.xlu1 %v242_v0, %s664_s27  ;;  %v744_v1 = vld [vmem:[%s221_s5] sm:$0x3]  ;;  %v246_v4 = vrot.slane %v242_v0, 6  ;;  %v254_v5 = vrot.slane %v242_v0, 4  ;;  %v262_v7 = vrot.slane %v242_v0, 2  ;;  %s674_s21 = smov 122  }
  0x16   : > { %317 = vrot.lane.b32.xlu0 %v744_v1, %s665_s6  ;;  %v245_v2 = vrot.slane %v744_v1, 6  ;;  %v253_v6 = vrot.slane %v744_v1, 4  ;;  %v261_v8 = vrot.slane %v744_v1, 2  ;;  %s675_s22 = smov 121   ;;  %s676_s23 = smov 127  }
  0x17   : > { %s678_s24 = smov 126   ;;  %s679_s25 = smov 125  }
  0x18   : > { %s546_s28 = sshll.u32 %s646_s12, 7  ;;  %p234_p8 = scmp.lt.s32.totalorder %s646_s12, 3 }
  0x19   : > { %323 = vrot.lane.b32.xlu1 %v245_v2, %s667_s7  ;;  %s543_s29 = sshll.u32 %s811_s13, 2 }
  0x1a   : > { %319 = vrot.lane.b32.xlu0 %v242_v0, %s665_s6  ;;  %s815_s12 = smov (!%p234_p8, %s646_s12), 3 }
  0x1b   : > { %s237_s30 = sadd.s32 %s543_s29, %s815_s12 }
  0x1c   : > { %s544_s4 = sshll.u32 %s237_s30, 3 }
  0x1d   : > { %325 = vrot.lane.b32.xlu1 %v246_v4, %s667_s7  ;;  %s239_s7 = scalar_lea.vmem %s799_s3, %s544_s4 }
  0x1e   : > { %293 = vrot.lane.b32.xlu0 %v744_v1, %s664_s27 }
  0x21   : > { %331 = vrot.lane.b32.xlu1 %v254_v5, %s668_s8 }
  0x22   : > { %329 = vrot.lane.b32.xlu0 %v253_v6, %s668_s8 }
  0x25   : > { %301 = vrot.lane.b32.xlu1 %v246_v4, %s669_s9 }
  0x26   : > { %299 = vrot.lane.b32.xlu0 %v245_v2, %s669_s9 }
  0x29   : > { %307 = vrot.lane.b32.xlu1 %v254_v5, %s670_s10 }
  0x2a   : > { %305 = vrot.lane.b32.xlu0 %v253_v6, %s670_s10 }
  0x2d   : > { %313 = vrot.lane.b32.xlu1 %v262_v7, %s671_s11 }
  0x2e   : > { %311 = vrot.lane.b32.xlu0 %v261_v8, %s671_s11 }
  0x31   : > { %271 = vrot.lane.b32.xlu1 %v242_v0, %s672_s19  ;;  %v414_v0 = vlaneseq }
  0x32   : > { %269 = vrot.lane.b32.xlu0 %v744_v1, %s672_s19 }
  0x35   : > { %277 = vrot.lane.b32.xlu1 %v246_v4, %s673_s20 }
  0x36   : > { %275 = vrot.lane.b32.xlu0 %v245_v2, %s673_s20 }
  0x39   : > { %283 = vrot.lane.b32.xlu1 %v254_v5, %s674_s21 }
  0x3a   : > { %281 = vrot.lane.b32.xlu0 %v253_v6, %s674_s21 }
  0x3d   : > { %289 = vrot.lane.b32.xlu1 %v262_v7, %s675_s22 }
  0x3e   : > { %287 = vrot.lane.b32.xlu0 %v261_v8, %s675_s22 }
  0x41   : > { %249 = vrot.lane.b32.xlu1 %v246_v4, %s676_s23 }
  0x42   : > { %247 = vrot.lane.b32.xlu0 %v245_v2, %s676_s23  ;;  %v415_v2 = vand.u32 127, %v414_v0 }
  0x45   : > { %257 = vrot.lane.b32.xlu1 %v254_v5, %s678_s24 }
  0x46   : > { %255 = vrot.lane.b32.xlu0 %v253_v6, %s678_s24 }
  0x49   : > { %265 = vrot.lane.b32.xlu1 %v262_v7, %s679_s25 }
  0x4a   : > { %263 = vrot.lane.b32.xlu0 %v261_v8, %s679_s25 }
  0x87   : > { %v296_v9 = vpop.permute.xlu1 %295 }
  0x88   : > { %v318_v10 = vpop.permute.xlu0 %317 }
  0x8b   : > { %v324_v11 = vpop.permute.xlu1 %323 }
  0x8c   : > { %v320_v12 = vpop.permute.xlu0 %319 }
  0x8d   : > { %v322_v17 = vsel %vm321_vm2, %v318_v10, %v320_v12  ;;  %vm368_vm2 = vcmask 490496  }
  0x8f   : > { %v326_v13 = vpop.permute.xlu1 %325 }
  0x90   : > { %v294_v14 = vpop.permute.xlu0 %293  ;;  %v328_v15 = vsel %vm327_vm1, %v324_v11, %v326_v13  ;;  %vm267_vm1 = vcmask 1022976  }
  0x91   : > { %v364_v20 = vsel %vm335_vm4, %v322_v17, %v328_v15  ;;  %v298_v30 = vsel %vm297_vm9, %v294_v14, %v296_v9 }
  0x93   : > { %v332_v16 = vpop.permute.xlu1 %331 }
  0x94   : > { %v330_v18 = vpop.permute.xlu0 %329 }
  0x95   : > { %v334_v19 = vsel %vm333_vm3, %v330_v18, %v332_v16 }
  0x96   : > { %v366_v21 = vsel %vm339_vm5, %v364_v20, %v334_v19 }
  0x97   : > { %v302_v22 = vpop.permute.xlu1 %301  ;;  %v372_v23 = vsel %vm342_vm6, %v366_v21, 0 }
  0x98   : > { %v300_v24 = vpop.permute.xlu0 %299  ;;  %556 = vmatpush3.bf16.msra.mxu0 %v372_v23 }
  0x99   : > { %557 = vmatprep.subr.bf16.mxu0 %v666_v3  ;;  %v304_v27 = vsel %vm303_vm7, %v300_v24, %v302_v22 }
  0x9a   : > { %v356_v31 = vsel %vm335_vm4, %v298_v30, %v304_v27 }
  0x9b   : > { %v308_v25 = vpop.permute.xlu1 %307 }
  0x9c   : > { %v306_v26 = vpop.permute.xlu0 %305 }
  0x9d   : > { %v310_v28 = vsel %vm309_vm8, %v306_v26, %v308_v25 }
  0x9e   : > { %v358_v34 = vsel %vm339_vm5, %v356_v31, %v310_v28 }
  0x9f   : > { %v314_v29 = vpop.permute.xlu1 %313 }
  0xa0   : > { %v312_v32 = vpop.permute.xlu0 %311 }
  0xa1   : > { %v316_v33 = vsel %vm315_vm10, %v312_v32, %v314_v29 }
  0xa2   : > { %v360_v35 = vsel %vm342_vm6, %v358_v34, %v316_v33 }
  0xa3   : > { %v272_v36 = vpop.permute.xlu1 %271  ;;  %558 = vmatpush3.bf16.msra.mxu0 %v360_v35 }
  0xa4   : > { %v270_v37 = vpop.permute.xlu0 %269  ;;  %559 = vmatprep.subr.bf16.mxu0 %v666_v3 }
  0xa5   : > { %v274_v45 = vsel %vm273_vm13, %v270_v37, %v272_v36 }
  0xa7   : > { %v278_v38 = vpop.permute.xlu1 %277 }
  0xa8   : > { %v276_v39 = vpop.permute.xlu0 %275 }
  0xa9   : > { %v280_v42 = vsel %vm279_vm11, %v276_v39, %v278_v38 }
  0xaa   : > { %v348_v46 = vsel %vm335_vm4, %v274_v45, %v280_v42 }
  0xab   : > { %v284_v40 = vpop.permute.xlu1 %283 }
  0xac   : > { %v282_v41 = vpop.permute.xlu0 %281 }
  0xad   : > { %v286_v43 = vsel %vm285_vm12, %v282_v41, %v284_v40 }
  0xae   : > { %v350_v49 = vsel %vm339_vm5, %v348_v46, %v286_v43 }
  0xaf   : > { %v290_v44 = vpop.permute.xlu1 %289 }
  0xb0   : > { %v288_v47 = vpop.permute.xlu0 %287 }
  0xb1   : > { %v292_v48 = vsel %vm291_vm14, %v288_v47, %v290_v44 }
  0xb2   : > { %v352_v50 = vsel %vm342_vm6, %v350_v49, %v292_v48 }
  0xb3   : > { %v250_v51 = vpop.permute.xlu1 %249  ;;  %560 = vmatpush3.bf16.msra.mxu0 %v352_v50 }
  0xb4   : > { %v248_v52 = vpop.permute.xlu0 %247  ;;  %561 = vmatprep.subr.bf16.mxu0 %v666_v3 }
  0xb5   : > { %v252_v55 = vsel %vm251_vm15, %v248_v52, %v250_v51 }
  0xb6   : > { %v338_v58 = vsel %vm335_vm4, %v744_v1, %v252_v55  ;;  %v417_v1 = vstv %s546_s28  ;;  %vm428_vm4 = vcmask 7168  }
  0xb7   : > { %v258_v53 = vpop.permute.xlu1 %257  ;;  %v418_v4 = vadd.s32 %v417_v1, %v415_v2 }
  0xb8   : > { %v256_v54 = vpop.permute.xlu0 %255 }
  0xb9   : > { %v260_v56 = vsel %vm259_vm0, %v256_v54, %v258_v53  ;;  %vm419_vm3 = vcmp.lt.s32.totalorder %v418_v4, 512 }
  0xba   : > { %v341_v61 = vsel %vm339_vm5, %v338_v58, %v260_v56  ;;  %v547_v5 = vsel %vm419_vm3, 1.0, %v666_v3  ;;  %vm430_vm5 = vcmask 15360  }
  0xbb   : > { %v266_v57 = vpop.permute.xlu1 %265 }
  0xbc   : > { %v264_v59 = vpop.permute.xlu0 %263 }
  0xbd   : > { %v268_v60 = vsel %vm267_vm1, %v264_v59, %v266_v57 }
  0xbe   : > { %v344_v62 = vsel %vm342_vm6, %v341_v61, %v268_v60 }
  0xbf   : > { %562 = vmatpush3.bf16.msra.mxu0 %v344_v62 }
  0xc2   : > { %564 = vmatmul.mubr.msk.bf16.vlgmr.msra.gmra.mxu0 %vm368_vm2, %v367_v63 }
 0x182   : > { %v408_v6 = vpop.f32.mrf.mxu0 }
 0x183   : > { %v422_v7 = vmul.f32 %v547_v5, %v408_v6 }
 0x184   : > { %v565_v8 = vpop.f32.mrf.mxu0 }
 0x185   : > { %423 = vadd.xlane.f32.xlu0 %v422_v7  ;;  %v425_v9 = vmul.f32 %v422_v7, %v408_v6 }
 0x186   : > { %v411_v10 = vpop.f32.mrf.mxu0 }
 0x187   : > { %426 = vadd.xlane.f32.xlu1 %v425_v9 }
 0x188   : > { %v566_v11 = vpop.f32.mrf.mxu0 }
 0x20e   : > { %v424_v3 = vpop.xlane.xlu0 %423 }
 0x210   : > { %v427_v12 = vpop.xlane.xlu1 %426 }
 0x211   : > { %v429_v13 = vsel %vm428_vm4, %v424_v3, %v427_v12 }
 0x212   : > { %431 = vst.msk [vmem:[%s239_s7] sm:$0xff] %vm430_vm5, %v429_v13 }
 0x213 PF: > { %s13_s16 = sadd.s32 1, %s662_s16   ;;  %s800_s12 = smov %s654_s14 }
 0x214   : > { %p10_p9 = scmp.ge.s32.totalorder %s13_s16, 10   ;;  %s801_s13 = smov %s658_s15 }
 0x215   : > { %s802_s14 = smov %s805_s17  ;;  %s803_s15 = smov %s809_s18 }
 0x216   :  { %12 = sbr.rel (!%p10_p9) target bundleno = 3 (0x3), region = 65 }

</bundles_post_ra>
